<compile_context>
chip_gen: v6e
topology: v6e:2x2x1
jax: 0.10.0
libtpu: 0.0.40
codegen_flags: <defaults>
</compile_context>

<pallas_src>
import functools
import math

import jax
import jax.numpy as jnp
from jax import lax
from jax.experimental import pallas as pl
from jax.experimental.pallas import tpu as pltpu
import numpy as np


def _attention_kernel(x_ref, wqkv_ref, bqkv_ref, wp_ref, bp_ref, o_ref, *,
                      n_heads, head_dim, b_blk):
    """One grid step: b_blk batch elements, flattened to M = b_blk*T rows."""
    M, C = x_ref.shape
    T = M // b_blk
    D = head_dim
    scale = 1.0 / math.sqrt(D)

    # ---- fused QKV projection: one wide bf16 MXU matmul, f32 accumulation ----
    xf = x_ref[...].astype(jnp.bfloat16)                                # (M, C)
    qkv = (jnp.dot(xf, wqkv_ref[...], preferred_element_type=jnp.float32)
           + bqkv_ref[...])                                             # (M, 3C) f32

    # ---- additive causal bias, built ONCE per grid step (hoisted out of loops) ----
    row = lax.broadcasted_iota(jnp.int32, (T, T), 0)
    col = lax.broadcasted_iota(jnp.int32, (T, T), 1)
    mask_bias = jnp.where(row >= col, 0.0, -1e30).astype(jnp.float32)   # (T, T)

    bpv = bp_ref[...]                                                   # (1, C) f32

    # ---- per-(batch, head) attention; out-proj accumulated per head (no concat) ----
    for b in range(b_blk):                       # b_blk <= 2, compile-time static
        r0 = b * T
        acc = jnp.zeros((T, C), jnp.float32)
        for h in range(n_heads):                 # n_heads small & compile-time static
            c0 = h * D
            qh = qkv[r0:r0 + T, 0 * C + c0:0 * C + c0 + D].astype(jnp.bfloat16)
            kh = qkv[r0:r0 + T, 1 * C + c0:1 * C + c0 + D].astype(jnp.bfloat16)
            vh = qkv[r0:r0 + T, 2 * C + c0:2 * C + c0 + D].astype(jnp.bfloat16)

            # scores = q @ k^T / sqrt(D) + causal bias (contract on D, no transpose op)
            s = jnp.einsum("td,sd->ts", qh, kh,
                           preferred_element_type=jnp.float32) * scale + mask_bias
            s_max = jnp.max(s, axis=-1, keepdims=True)
            e = jnp.exp(s - s_max)
            p = e * pl.reciprocal(jnp.sum(e, axis=-1, keepdims=True), approx=True)

            att_h = jnp.dot(p.astype(jnp.bfloat16), vh,
                            preferred_element_type=jnp.float32)         # (T, D) f32

            # acc += att_h @ Wp[h*D:(h+1)*D, :]  (== concat-heads then project)
            wp_h = wp_ref[c0:c0 + D, :].astype(jnp.bfloat16)            # (D, C) bf16
            acc = acc + jnp.dot(att_h.astype(jnp.bfloat16), wp_h,
                                preferred_element_type=jnp.float32)

        o_ref[r0:r0 + T, :] = (acc + bpv).astype(o_ref.dtype)


def masked_causal_attention(x, params, n_heads):
    """x: (B, T, C) float32. params: dict of pre-transposed (in, out) weights & (1, out) biases."""
    B, T, C = x.shape
    assert C % n_heads == 0
    D = C // n_heads

    # --- fuse QKV weights / biases; MXU-fed Wqkv stored bf16 (f32 accumulation) ---
    wqkv = jnp.concatenate([params["wq"], params["wk"], params["wv"]],
                           axis=1).astype(jnp.bfloat16)                 # (C, 3C) bf16
    bqkv = jnp.concatenate([params["bq"], params["bk"], params["bv"]], axis=1)  # (1, 3C) f32
    wp = params["wp"].astype(jnp.float32)    # (C, C) f32: per-head sublane slices stay aligned
    bp = params["bp"].astype(jnp.float32)    # (1, C) f32

    # --- batch blocking: at most 2 fat blocks (one per v7x TensorCore); on single-TC
    #     v5e/v6e this is only 2 serial grid steps instead of B.  Fall back to 1 block
    #     if the per-block row count would not be 8-sublane aligned. ---
    n_blocks = 2 if (B >= 2 and B % 2 == 0 and ((B // 2) * T) % 8 == 0) else 1
    b_blk = B // n_blocks
    M = b_blk * T

    x2 = x.reshape(B * T, C)   # flatten batch rows so projections see M = b_blk*T rows

    kernel = functools.partial(_attention_kernel,
                               n_heads=n_heads, head_dim=D, b_blk=b_blk)

    out = pl.pallas_call(
        kernel,
        out_shape=jax.ShapeDtypeStruct((B * T, C), jnp.float32),
        grid_spec=pltpu.PrefetchScalarGridSpec(
            num_scalar_prefetch=0,
            grid=(n_blocks,),
            in_specs=[
                pl.BlockSpec((M, C), lambda i: (i, 0)),          # x rows for this block
                pl.BlockSpec((C, 3 * C), lambda i: (0, 0)),      # fused Wqkv (bf16)
                pl.BlockSpec((1, 3 * C), lambda i: (0, 0)),      # fused bqkv (f32)
                pl.BlockSpec((C, C), lambda i: (0, 0)),          # Wproj (f32)
                pl.BlockSpec((1, C), lambda i: (0, 0)),          # bproj (f32)
            ],
            out_specs=pl.BlockSpec((M, C), lambda i: (i, 0)),
        ),
        compiler_params=pltpu.CompilerParams(
            dimension_semantics=("parallel",)),
    )(x2, wqkv, bqkv, wp, bp)

    return out.reshape(B, T, C)


def _reference(x, params, n_heads):
    """Pure-JAX f32 reference mirroring the PyTorch forward (eval mode)."""
    B, T, C = x.shape
    D = C // n_heads
    q = x @ params["wq"] + params["bq"][0]
    k = x @ params["wk"] + params["bk"][0]
    v = x @ params["wv"] + params["bv"][0]
    q = q.reshape(B, T, n_heads, D).transpose(0, 2, 1, 3)
    k = k.reshape(B, T, n_heads, D).transpose(0, 2, 1, 3)
    v = v.reshape(B, T, n_heads, D).transpose(0, 2, 1, 3)
    w = jnp.einsum("bntd,bnsd->bnts", q, k) / math.sqrt(D)
    mask = jnp.tril(jnp.ones((T, T), dtype=bool))
    w = jnp.where(mask[None, None], w, -jnp.inf)
    p = jax.nn.softmax(w, axis=-1)
    att = jnp.einsum("bnts,bnsd->bntd", p, v)
    att = att.transpose(0, 2, 1, 3).reshape(B, T, C)
    return att @ params["wp"] + params["bp"][0]


def _init_params(key, h_dim):
    """Deterministic parameter init (shapes mirror nn.Linear(h_dim, h_dim) x4)."""
    ks = jax.random.split(key, 8)
    bound = 1.0 / math.sqrt(h_dim)

    def lin(kw, kb):
        # stored pre-transposed: (in, out); bias kept 2D (1, out) for TPU layout
        w = jax.random.uniform(kw, (h_dim, h_dim), jnp.float32, -bound, bound)
        b = jax.random.uniform(kb, (1, h_dim), jnp.float32, -bound, bound)
        return w, b

    wq, bq = lin(ks[0], ks[1])
    wk, bk = lin(ks[2], ks[3])
    wv, bv = lin(ks[4], ks[5])
    wp, bp = lin(ks[6], ks[7])
    return dict(wq=wq, bq=bq, wk=wk, bk=bk, wv=wv, bv=bv, wp=wp, bp=bp)


if __name__ == "__main__":
    B, T, C, n_heads = 2, 8, 32, 4   # max_T == T == 8, h_dim == 32, head_dim == 8

    key = jax.random.PRNGKey(0)
    k_x, k_p = jax.random.split(key)
    x = jax.random.normal(k_x, (B, T, C), jnp.float32)
    params = _init_params(k_p, C)

    out = masked_causal_attention(x, params, n_heads)
    out = jax.block_until_ready(out)

    ref = _reference(x, params, n_heads)
    # Tolerance accounts for bf16 MXU operands + approx reciprocal in the kernel
    # vs. the f32 reference (PyTorch semantics).
    np.testing.assert_allclose(np.asarray(out), np.asarray(ref), rtol=5e-2, atol=5e-2)

    print("KERNEL_OK")
</pallas_src>

<mosaic_0001>
module attributes {stable_mosaic.version = 11 : i64} {
  func.func @_attention_kernel(%arg0: i32, %arg1: memref<8x32xf32, #tpu.memory_space<vmem>>, %arg2: memref<32x96xbf16, #tpu.memory_space<vmem>>, %arg3: memref<1x96xf32, #tpu.memory_space<vmem>>, %arg4: memref<32x32xf32, #tpu.memory_space<vmem>>, %arg5: memref<1x32xf32, #tpu.memory_space<vmem>>, %arg6: memref<8x32xf32, #tpu.memory_space<vmem>>) attributes {dimension_semantics = [#tpu.dimension_semantics<parallel>], iteration_bounds = array<i64: 2>, scalar_prefetch = 0 : i64, scratch_operands = 0 : i64, tpu.core_type = #tpu.core_type<tc>, window_params = [{transform_indices = @transform_0, window_bounds = array<i64: 8, 32>}, {pipeline_mode = #tpu.pipeline_mode<synchronous>, transform_indices = @transform_1, window_bounds = array<i64: 32, 96>}, {pipeline_mode = #tpu.pipeline_mode<synchronous>, transform_indices = @transform_2, window_bounds = array<i64: 1, 96>}, {pipeline_mode = #tpu.pipeline_mode<synchronous>, transform_indices = @transform_3, window_bounds = array<i64: 32, 32>}, {pipeline_mode = #tpu.pipeline_mode<synchronous>, transform_indices = @transform_4, window_bounds = array<i64: 1, 32>}, {transform_indices = @transform_5, window_bounds = array<i64: 8, 32>}]} {
    %c0 = arith.constant 0 : index
    %c0_0 = arith.constant 0 : index
    %0 = vector.load %arg1[%c0, %c0_0] : memref<8x32xf32, #tpu.memory_space<vmem>>, vector<8x32xf32>
    %1 = arith.truncf %0 : vector<8x32xf32> to vector<8x32xbf16>
    %c0_1 = arith.constant 0 : index
    %c0_2 = arith.constant 0 : index
    %2 = vector.load %arg2[%c0_1, %c0_2] : memref<32x96xbf16, #tpu.memory_space<vmem>>, vector<32x96xbf16>
    %cst = arith.constant dense<0.000000e+00> : vector<8x96xf32>
    %3 = tpu.matmul %1, %2, %cst {dimension_numbers = #tpu.dot_dimension_numbers<[1], [0], [0], [1], [0, 0, 1, 1], [], []>} : vector<8x32xbf16>, vector<32x96xbf16>, vector<8x96xf32> -> vector<8x96xf32>
    %c0_3 = arith.constant 0 : index
    %c0_4 = arith.constant 0 : index
    %4 = vector.load %arg3[%c0_3, %c0_4] : memref<1x96xf32, #tpu.memory_space<vmem>>, vector<1x96xf32>
    %5 = vector.broadcast %4 : vector<1x96xf32> to vector<8x96xf32>
    %6 = arith.addf %3, %5 : vector<8x96xf32>
    %7 = tpu.iota {dimensions = array<i32: 0>} : vector<8x8xi32>
    %8 = tpu.iota {dimensions = array<i32: 1>} : vector<8x8xi32>
    %9 = arith.cmpi sge, %7, %8 : vector<8x8xi32>
    %cst_5 = arith.constant 0.000000e+00 : f32
    %cst_6 = arith.constant -1.000000e+30 : f32
    %10 = vector.broadcast %cst_5 : f32 to vector<8x8xf32>
    %11 = vector.broadcast %cst_6 : f32 to vector<8x8xf32>
    %12 = arith.select %9, %10, %11 : vector<8x8xi1>, vector<8x8xf32>
    %c0_7 = arith.constant 0 : index
    %c0_8 = arith.constant 0 : index
    %13 = vector.load %arg5[%c0_7, %c0_8] : memref<1x32xf32, #tpu.memory_space<vmem>>, vector<1x32xf32>
    %cst_9 = arith.constant 0.000000e+00 : f32
    %14 = vector.broadcast %cst_9 : f32 to vector<8x32xf32>
    %15 = vector.extract_strided_slice %6 {offsets = [0, 0], sizes = [8, 8], strides = [1, 1]} : vector<8x96xf32> to vector<8x8xf32>
    %16 = arith.truncf %15 : vector<8x8xf32> to vector<8x8xbf16>
    %17 = vector.extract_strided_slice %6 {offsets = [0, 32], sizes = [8, 8], strides = [1, 1]} : vector<8x96xf32> to vector<8x8xf32>
    %18 = arith.truncf %17 : vector<8x8xf32> to vector<8x8xbf16>
    %19 = vector.extract_strided_slice %6 {offsets = [0, 64], sizes = [8, 8], strides = [1, 1]} : vector<8x96xf32> to vector<8x8xf32>
    %20 = arith.truncf %19 : vector<8x8xf32> to vector<8x8xbf16>
    "tpu.trace_start"() <{level = 10 : i32, message = "td,sd->ts"}> : () -> ()
    %cst_10 = arith.constant dense<0.000000e+00> : vector<8x8xf32>
    %21 = tpu.matmul %16, %18, %cst_10 {dimension_numbers = #tpu.dot_dimension_numbers<[1], [1], [0], [0], [0, 0, 1, 0], [], []>} : vector<8x8xbf16>, vector<8x8xbf16>, vector<8x8xf32> -> vector<8x8xf32>
    "tpu.trace_stop"() : () -> ()
    %cst_11 = arith.constant 0.353553385 : f32
    %22 = vector.broadcast %cst_11 : f32 to vector<8x8xf32>
    %23 = arith.mulf %21, %22 : vector<8x8xf32>
    %24 = arith.addf %23, %12 : vector<8x8xf32>
    %cst_12 = arith.constant dense<0xFF800000> : vector<8xf32>
    %25 = vector.multi_reduction <maximumf>, %24, %cst_12 [1] : vector<8x8xf32> to vector<8xf32>
    %26 = vector.shape_cast %25 : vector<8xf32> to vector<8x1xf32>
    %27 = vector.broadcast %26 : vector<8x1xf32> to vector<8x8xf32>
    %28 = arith.subf %24, %27 : vector<8x8xf32>
    %29 = math.exp %28 : vector<8x8xf32>
    %cst_13 = arith.constant dense<0.000000e+00> : vector<8xf32>
    %30 = vector.multi_reduction <add>, %29, %cst_13 [1] : vector<8x8xf32> to vector<8xf32>
    %31 = vector.shape_cast %30 : vector<8xf32> to vector<8x1xf32>
    %32 = tpu.reciprocal %31 {approx = true} : vector<8x1xf32> -> vector<8x1xf32>
    %33 = vector.broadcast %32 : vector<8x1xf32> to vector<8x8xf32>
    %34 = arith.mulf %29, %33 : vector<8x8xf32>
    %35 = arith.truncf %34 : vector<8x8xf32> to vector<8x8xbf16>
    %cst_14 = arith.constant dense<0.000000e+00> : vector<8x8xf32>
    %36 = tpu.matmul %35, %20, %cst_14 {dimension_numbers = #tpu.dot_dimension_numbers<[1], [0], [0], [1], [0, 0, 1, 1], [], []>} : vector<8x8xbf16>, vector<8x8xbf16>, vector<8x8xf32> -> vector<8x8xf32>
    %c0_15 = arith.constant 0 : index
    %c0_16 = arith.constant 0 : index
    %37 = vector.load %arg4[%c0_15, %c0_16] : memref<32x32xf32, #tpu.memory_space<vmem>>, vector<8x32xf32>
    %38 = arith.truncf %37 : vector<8x32xf32> to vector<8x32xbf16>
    %39 = arith.truncf %36 : vector<8x8xf32> to vector<8x8xbf16>
    %cst_17 = arith.constant dense<0.000000e+00> : vector<8x32xf32>
    %40 = tpu.matmul %39, %38, %cst_17 {dimension_numbers = #tpu.dot_dimension_numbers<[1], [0], [0], [1], [0, 0, 1, 1], [], []>} : vector<8x8xbf16>, vector<8x32xbf16>, vector<8x32xf32> -> vector<8x32xf32>
    %41 = arith.addf %14, %40 : vector<8x32xf32>
    %42 = vector.extract_strided_slice %6 {offsets = [0, 8], sizes = [8, 8], strides = [1, 1]} : vector<8x96xf32> to vector<8x8xf32>
    %43 = arith.truncf %42 : vector<8x8xf32> to vector<8x8xbf16>
    %44 = vector.extract_strided_slice %6 {offsets = [0, 40], sizes = [8, 8], strides = [1, 1]} : vector<8x96xf32> to vector<8x8xf32>
    %45 = arith.truncf %44 : vector<8x8xf32> to vector<8x8xbf16>
    %46 = vector.extract_strided_slice %6 {offsets = [0, 72], sizes = [8, 8], strides = [1, 1]} : vector<8x96xf32> to vector<8x8xf32>
    %47 = arith.truncf %46 : vector<8x8xf32> to vector<8x8xbf16>
    "tpu.trace_start"() <{level = 10 : i32, message = "td,sd->ts"}> : () -> ()
    %cst_18 = arith.constant dense<0.000000e+00> : vector<8x8xf32>
    %48 = tpu.matmul %43, %45, %cst_18 {dimension_numbers = #tpu.dot_dimension_numbers<[1], [1], [0], [0], [0, 0, 1, 0], [], []>} : vector<8x8xbf16>, vector<8x8xbf16>, vector<8x8xf32> -> vector<8x8xf32>
    "tpu.trace_stop"() : () -> ()
    %cst_19 = arith.constant 0.353553385 : f32
    %49 = vector.broadcast %cst_19 : f32 to vector<8x8xf32>
    %50 = arith.mulf %48, %49 : vector<8x8xf32>
    %51 = arith.addf %50, %12 : vector<8x8xf32>
    %cst_20 = arith.constant dense<0xFF800000> : vector<8xf32>
    %52 = vector.multi_reduction <maximumf>, %51, %cst_20 [1] : vector<8x8xf32> to vector<8xf32>
    %53 = vector.shape_cast %52 : vector<8xf32> to vector<8x1xf32>
    %54 = vector.broadcast %53 : vector<8x1xf32> to vector<8x8xf32>
    %55 = arith.subf %51, %54 : vector<8x8xf32>
    %56 = math.exp %55 : vector<8x8xf32>
    %cst_21 = arith.constant dense<0.000000e+00> : vector<8xf32>
    %57 = vector.multi_reduction <add>, %56, %cst_21 [1] : vector<8x8xf32> to vector<8xf32>
    %58 = vector.shape_cast %57 : vector<8xf32> to vector<8x1xf32>
    %59 = tpu.reciprocal %58 {approx = true} : vector<8x1xf32> -> vector<8x1xf32>
    %60 = vector.broadcast %59 : vector<8x1xf32> to vector<8x8xf32>
    %61 = arith.mulf %56, %60 : vector<8x8xf32>
    %62 = arith.truncf %61 : vector<8x8xf32> to vector<8x8xbf16>
    %cst_22 = arith.constant dense<0.000000e+00> : vector<8x8xf32>
    %63 = tpu.matmul %62, %47, %cst_22 {dimension_numbers = #tpu.dot_dimension_numbers<[1], [0], [0], [1], [0, 0, 1, 1], [], []>} : vector<8x8xbf16>, vector<8x8xbf16>, vector<8x8xf32> -> vector<8x8xf32>
    %c8 = arith.constant 8 : index
    %c0_23 = arith.constant 0 : index
    %64 = vector.load %arg4[%c8, %c0_23] : memref<32x32xf32, #tpu.memory_space<vmem>>, vector<8x32xf32>
    %65 = arith.truncf %64 : vector<8x32xf32> to vector<8x32xbf16>
    %66 = arith.truncf %63 : vector<8x8xf32> to vector<8x8xbf16>
    %cst_24 = arith.constant dense<0.000000e+00> : vector<8x32xf32>
    %67 = tpu.matmul %66, %65, %cst_24 {dimension_numbers = #tpu.dot_dimension_numbers<[1], [0], [0], [1], [0, 0, 1, 1], [], []>} : vector<8x8xbf16>, vector<8x32xbf16>, vector<8x32xf32> -> vector<8x32xf32>
    %68 = arith.addf %41, %67 : vector<8x32xf32>
    %69 = vector.extract_strided_slice %6 {offsets = [0, 16], sizes = [8, 8], strides = [1, 1]} : vector<8x96xf32> to vector<8x8xf32>
    %70 = arith.truncf %69 : vector<8x8xf32> to vector<8x8xbf16>
    %71 = vector.extract_strided_slice %6 {offsets = [0, 48], sizes = [8, 8], strides = [1, 1]} : vector<8x96xf32> to vector<8x8xf32>
    %72 = arith.truncf %71 : vector<8x8xf32> to vector<8x8xbf16>
    %73 = vector.extract_strided_slice %6 {offsets = [0, 80], sizes = [8, 8], strides = [1, 1]} : vector<8x96xf32> to vector<8x8xf32>
    %74 = arith.truncf %73 : vector<8x8xf32> to vector<8x8xbf16>
    "tpu.trace_start"() <{level = 10 : i32, message = "td,sd->ts"}> : () -> ()
    %cst_25 = arith.constant dense<0.000000e+00> : vector<8x8xf32>
    %75 = tpu.matmul %70, %72, %cst_25 {dimension_numbers = #tpu.dot_dimension_numbers<[1], [1], [0], [0], [0, 0, 1, 0], [], []>} : vector<8x8xbf16>, vector<8x8xbf16>, vector<8x8xf32> -> vector<8x8xf32>
    "tpu.trace_stop"() : () -> ()
    %cst_26 = arith.constant 0.353553385 : f32
    %76 = vector.broadcast %cst_26 : f32 to vector<8x8xf32>
    %77 = arith.mulf %75, %76 : vector<8x8xf32>
    %78 = arith.addf %77, %12 : vector<8x8xf32>
    %cst_27 = arith.constant dense<0xFF800000> : vector<8xf32>
    %79 = vector.multi_reduction <maximumf>, %78, %cst_27 [1] : vector<8x8xf32> to vector<8xf32>
    %80 = vector.shape_cast %79 : vector<8xf32> to vector<8x1xf32>
    %81 = vector.broadcast %80 : vector<8x1xf32> to vector<8x8xf32>
    %82 = arith.subf %78, %81 : vector<8x8xf32>
    %83 = math.exp %82 : vector<8x8xf32>
    %cst_28 = arith.constant dense<0.000000e+00> : vector<8xf32>
    %84 = vector.multi_reduction <add>, %83, %cst_28 [1] : vector<8x8xf32> to vector<8xf32>
    %85 = vector.shape_cast %84 : vector<8xf32> to vector<8x1xf32>
    %86 = tpu.reciprocal %85 {approx = true} : vector<8x1xf32> -> vector<8x1xf32>
    %87 = vector.broadcast %86 : vector<8x1xf32> to vector<8x8xf32>
    %88 = arith.mulf %83, %87 : vector<8x8xf32>
    %89 = arith.truncf %88 : vector<8x8xf32> to vector<8x8xbf16>
    %cst_29 = arith.constant dense<0.000000e+00> : vector<8x8xf32>
    %90 = tpu.matmul %89, %74, %cst_29 {dimension_numbers = #tpu.dot_dimension_numbers<[1], [0], [0], [1], [0, 0, 1, 1], [], []>} : vector<8x8xbf16>, vector<8x8xbf16>, vector<8x8xf32> -> vector<8x8xf32>
    %c16 = arith.constant 16 : index
    %c0_30 = arith.constant 0 : index
    %91 = vector.load %arg4[%c16, %c0_30] : memref<32x32xf32, #tpu.memory_space<vmem>>, vector<8x32xf32>
    %92 = arith.truncf %91 : vector<8x32xf32> to vector<8x32xbf16>
    %93 = arith.truncf %90 : vector<8x8xf32> to vector<8x8xbf16>
    %cst_31 = arith.constant dense<0.000000e+00> : vector<8x32xf32>
    %94 = tpu.matmul %93, %92, %cst_31 {dimension_numbers = #tpu.dot_dimension_numbers<[1], [0], [0], [1], [0, 0, 1, 1], [], []>} : vector<8x8xbf16>, vector<8x32xbf16>, vector<8x32xf32> -> vector<8x32xf32>
    %95 = arith.addf %68, %94 : vector<8x32xf32>
    %96 = vector.extract_strided_slice %6 {offsets = [0, 24], sizes = [8, 8], strides = [1, 1]} : vector<8x96xf32> to vector<8x8xf32>
    %97 = arith.truncf %96 : vector<8x8xf32> to vector<8x8xbf16>
    %98 = vector.extract_strided_slice %6 {offsets = [0, 56], sizes = [8, 8], strides = [1, 1]} : vector<8x96xf32> to vector<8x8xf32>
    %99 = arith.truncf %98 : vector<8x8xf32> to vector<8x8xbf16>
    %100 = vector.extract_strided_slice %6 {offsets = [0, 88], sizes = [8, 8], strides = [1, 1]} : vector<8x96xf32> to vector<8x8xf32>
    %101 = arith.truncf %100 : vector<8x8xf32> to vector<8x8xbf16>
    "tpu.trace_start"() <{level = 10 : i32, message = "td,sd->ts"}> : () -> ()
    %cst_32 = arith.constant dense<0.000000e+00> : vector<8x8xf32>
    %102 = tpu.matmul %97, %99, %cst_32 {dimension_numbers = #tpu.dot_dimension_numbers<[1], [1], [0], [0], [0, 0, 1, 0], [], []>} : vector<8x8xbf16>, vector<8x8xbf16>, vector<8x8xf32> -> vector<8x8xf32>
    "tpu.trace_stop"() : () -> ()
    %cst_33 = arith.constant 0.353553385 : f32
    %103 = vector.broadcast %cst_33 : f32 to vector<8x8xf32>
    %104 = arith.mulf %102, %103 : vector<8x8xf32>
    %105 = arith.addf %104, %12 : vector<8x8xf32>
    %cst_34 = arith.constant dense<0xFF800000> : vector<8xf32>
    %106 = vector.multi_reduction <maximumf>, %105, %cst_34 [1] : vector<8x8xf32> to vector<8xf32>
    %107 = vector.shape_cast %106 : vector<8xf32> to vector<8x1xf32>
    %108 = vector.broadcast %107 : vector<8x1xf32> to vector<8x8xf32>
    %109 = arith.subf %105, %108 : vector<8x8xf32>
    %110 = math.exp %109 : vector<8x8xf32>
    %cst_35 = arith.constant dense<0.000000e+00> : vector<8xf32>
    %111 = vector.multi_reduction <add>, %110, %cst_35 [1] : vector<8x8xf32> to vector<8xf32>
    %112 = vector.shape_cast %111 : vector<8xf32> to vector<8x1xf32>
    %113 = tpu.reciprocal %112 {approx = true} : vector<8x1xf32> -> vector<8x1xf32>
    %114 = vector.broadcast %113 : vector<8x1xf32> to vector<8x8xf32>
    %115 = arith.mulf %110, %114 : vector<8x8xf32>
    %116 = arith.truncf %115 : vector<8x8xf32> to vector<8x8xbf16>
    %cst_36 = arith.constant dense<0.000000e+00> : vector<8x8xf32>
    %117 = tpu.matmul %116, %101, %cst_36 {dimension_numbers = #tpu.dot_dimension_numbers<[1], [0], [0], [1], [0, 0, 1, 1], [], []>} : vector<8x8xbf16>, vector<8x8xbf16>, vector<8x8xf32> -> vector<8x8xf32>
    %c24 = arith.constant 24 : index
    %c0_37 = arith.constant 0 : index
    %118 = vector.load %arg4[%c24, %c0_37] : memref<32x32xf32, #tpu.memory_space<vmem>>, vector<8x32xf32>
    %119 = arith.truncf %118 : vector<8x32xf32> to vector<8x32xbf16>
    %120 = arith.truncf %117 : vector<8x8xf32> to vector<8x8xbf16>
    %cst_38 = arith.constant dense<0.000000e+00> : vector<8x32xf32>
    %121 = tpu.matmul %120, %119, %cst_38 {dimension_numbers = #tpu.dot_dimension_numbers<[1], [0], [0], [1], [0, 0, 1, 1], [], []>} : vector<8x8xbf16>, vector<8x32xbf16>, vector<8x32xf32> -> vector<8x32xf32>
    %122 = arith.addf %95, %121 : vector<8x32xf32>
    %123 = vector.broadcast %13 : vector<1x32xf32> to vector<8x32xf32>
    %124 = arith.addf %122, %123 : vector<8x32xf32>
    %c0_39 = arith.constant 0 : index
    %c0_40 = arith.constant 0 : index
    %125 = vector.load %arg6[%c0_39, %c0_40] : memref<8x32xf32, #tpu.memory_space<vmem>>, vector<8x32xf32>
    tpu.vector_store %arg6[%c0_39, %c0_40], %124 {strides = array<i32>} : memref<8x32xf32, #tpu.memory_space<vmem>>, vector<8x32xf32>,
    return
  }
  func.func @transform_0(%arg0: i32) -> (i32, i32) {
    %c0_i32 = arith.constant 0 : i32
    %c0_i32_0 = arith.constant 0 : i32
    return %arg0, %c0_i32 : i32, i32
  }
  func.func @transform_1(%arg0: i32) -> (i32, i32) {
    %c0_i32 = arith.constant 0 : i32
    %c0_i32_0 = arith.constant 0 : i32
    %c0_i32_1 = arith.constant 0 : i32
    return %c0_i32, %c0_i32_0 : i32, i32
  }
  func.func @transform_2(%arg0: i32) -> (i32, i32) {
    %c0_i32 = arith.constant 0 : i32
    %c0_i32_0 = arith.constant 0 : i32
    %c0_i32_1 = arith.constant 0 : i32
    return %c0_i32, %c0_i32_0 : i32, i32
  }
  func.func @transform_3(%arg0: i32) -> (i32, i32) {
    %c0_i32 = arith.constant 0 : i32
    %c0_i32_0 = arith.constant 0 : i32
    %c0_i32_1 = arith.constant 0 : i32
    return %c0_i32, %c0_i32_0 : i32, i32
  }
  func.func @transform_4(%arg0: i32) -> (i32, i32) {
    %c0_i32 = arith.constant 0 : i32
    %c0_i32_0 = arith.constant 0 : i32
    %c0_i32_1 = arith.constant 0 : i32
    return %c0_i32, %c0_i32_0 : i32, i32
  }
  func.func @transform_5(%arg0: i32) -> (i32, i32) {
    %c0_i32 = arith.constant 0 : i32
    %c0_i32_0 = arith.constant 0 : i32
    return %arg0, %c0_i32 : i32, i32
  }
}

</mosaic_0001>

<bundles_post_ra>
// kernel: tpu_custom_call.1
= control target key start
LH: loop header
LB: loop body
LE: loop exit
PB: predicated region body
PF: predicated region fallthrough
CT: control target
= control target key end

     0   :  { %10 = vsyncpa [#allocation3], 0  ;;  %s1834_s0 = inlined_call_operand.hbm [shape: f32[16,32], index: 0, kind: input, shape index: {}]   ;;  %s1835_s1 = inlined_call_operand.hbm [shape: bf16[32,96], index: 1, kind: input, shape index: {}]   ;;  %s1836_s2 = inlined_call_operand.vmem [shape: f32[1,96], index: 2, kind: input, shape index: {}]   ;;  %s1837_s3 = inlined_call_operand.hbm [shape: f32[32,32], index: 3, kind: input, shape index: {}]   ;;  %s1838_s4 = inlined_call_operand.vmem [shape: f32[1,32], index: 4, kind: input, shape index: {}]   ;;  %s1839_s5 = inlined_call_operand.hbm [shape: f32[16,32], index: 5, kind: output, shape index: {}]  }
   0x1   :  { %12 = vsyncpa [#allocation3 + $0x1], 0 }
   0x2   :  { %13 = vsyncpa [#allocation6], 0 }
   0x3   :  { %14 = vsyncpa [#allocation4], 0 }
   0x4   :  { %16 = vsyncpa [#allocation4 + $0x1], 0  ;;  %s1550_s18 = smov 0   ;;  %s1552_s19 = smov 0  }
   0x5   :  { %s1554_s20 = smov 0   ;;  %s1556_s21 = smov 0  }
   0x6 LB: > { %s1571_s22 = sadd.s32 4294967295, %s1496_s21   ;;  %s1105_s23 = sadd.s32 4294967294, %s1496_s21   ;;  %s1496_s21 = sphi %s1556_s21, %s1861_s21   ;;  %s1492_s20 = sphi %s1554_s20, %s1860_s20   ;;  %s1488_s19 = sphi %s1552_s19, %s1859_s19   ;;  %s1484_s18 = sphi %s1550_s18, %s1858_s18  }
   0x7   : > { %p42_p0 = scmp.ne.s32.totalorder %s1488_s19, %s1484_s18  ;;  %p1840_p1 = scmp.eq.s32.totalorder %s1571_s22, 0 }
   0x8   : > { %p156_p3 = scmp.eq.s32.totalorder %s1105_s23, 1  ;;  %p1106_p5 = scmp.ge.s32.totalorder %s1496_s21, 1 }
   0x9   : > { %p1580_p4 = por %p1840_p1, %p42_p0  ;;  %p163_p7 = scmp.lt.s32.totalorder %s1496_s21, 3 }
   0xa   : > { %p1585_p6 = por %p156_p3, %p42_p0  ;;  %s1498_s27 = smov [#allocation5]  }
   0xb   : > { %s1844_s24 = scalar_select %p1580_p4, 1, 0 }
   0xc   : > { %s1845_s25 = scalar_select %p1585_p6, 1, 0 }
   0xd   : > { %p1590_p8 = pnand %p1106_p5, %p163_p7  ;;  %s175_s28 = sshll.u32 %s1498_s27, 4  ;;  %s176_s28 = int_to_ptr.vmem [resolvable:$true] %s175_s28 }
   0xe   : > { %s1499_s30 = smov [#allocation7]   ;;  %s1359_s7 = scalar_lea.vmem %s176_s28, 256 }
   0xf   : > { %s1846_s26 = scalar_select %p1590_p8, 1, 0 }
  0x10   : > { %p1257_p9 = pneg %p1590_p8  ;;  %s191_s6 = sshll.u32 %s1499_s30, 4  ;;  %s192_s6 = int_to_ptr.vmem [resolvable:$true] %s191_s6 }
  0x11   : > { %p1360_p13 = scmp.ne.s32.totalorder %s176_s28, %s1359_s7  ;;  %p1367_p5 = scmp.lt.s32.totalorder %s176_s28, %s176_s28 }
  0x12   : > { %p1599_p11 = pnand %p1257_p9, %p1840_p1  ;;  %p1368_p7 = scmp.lt.s32.totalorder %s1359_s7, %s1359_s7 }
  0x14   : > { %p1350_p12 = pneg %p1599_p11  ;;  %p1369_p10 = por %p1368_p7, %p1367_p5 }
  0x16   : > { %p1362_p0 = pnand %p1360_p13, %p1350_p12 }
  0x18   : > { %p1363_p3 = pneg %p1362_p0 }
  0x1a   : > { %p1370_p9 = pnand %p1369_p10, %p1363_p3 }
  0x1c   : > { %1373 = shalt.err (!%p1370_p9)
}
  0x1d   : > { %s1500_s8 = smov 64   ;;  %s1501_s9 = smov 4  }
  0x1e   : > { %1260 = dma.hbm_to_vmem [thread:$0]  (!%p1599_p11), %s1835_s1, 256, %s176_s28, [#allocation6], %s1500_s8, %s1500_s8, %s1501_s9  }
  0x1f   : > { %s1385_s12 = scalar_lea.vmem %s192_s6, 512  ;;  %p1393_p2 = scmp.lt.s32.totalorder %s192_s6, %s192_s6 }
  0x20   : > { %p1386_p1 = scmp.ne.s32.totalorder %s192_s6, %s1385_s12  ;;  %p1394_p6 = scmp.lt.s32.totalorder %s1385_s12, %s1385_s12 }
  0x22   : > { %p1388_p13 = pnand %p1386_p1, %p1350_p12  ;;  %p1395_p5 = por %p1394_p6, %p1393_p2 }
  0x24   : > { %p1389_p0 = pneg %p1388_p13 }
  0x26   : > { %p1396_p10 = pnand %p1395_p5, %p1389_p0 }
  0x28   : > { %1399 = shalt.err (!%p1396_p10)
}
  0x29   : > { %s1502_s13 = smov 128   ;;  %s1503_s14 = smov 8  }
  0x2a   : > { %1263 = dma.hbm_to_vmem [thread:$0]  (!%p1599_p11), %s1837_s3, 512, %s192_s6, [#allocation6], %s1502_s13, %s1502_s13, %s1503_s14  }
  0x2b   : > { %s1622_s17 = sadd.s32 1, %s1496_s21   ;;  %s29_s27 = sadd.s32 1, %s1492_s20 }
  0x2c   : > { %s26_s23 = ssub.s32 %s1496_s21, %s1622_s17  ;;  %p36_p2 = scmp.ne.s32.totalorder %s1492_s20, %s1488_s19 }
  0x2d   : > { %p27_p1 = scmp.eq.s32.totalorder %s26_s23, 0  ;;  %p37_p6 = scmp.eq.s32.totalorder %s1496_s21, 0 }
  0x2e   : > { %p1848_p3 = scmp.eq.s32.totalorder %s1571_s22, 1  ;;  %p1274_p9 = scmp.lt.s32.totalorder %s1496_s21, 2 }
  0x2f   : > { %s1631_s28 = scalar_select %p27_p1, %s1492_s20, %s29_s27  }
  0x30   : > { %p38_p12 = por %p37_p6, %p36_p2  ;;  %p1635_p7 = por %p1848_p3, %p36_p2 }
  0x31   : > { %s208_s29 = sand.u32 1, %s1492_s20   ;;  %s1111_s6 = sshll.u32 %s1496_s21, 7 }
  0x32   : > { %s1849_s30 = scalar_select %p1635_p7, 1, 0 }
  0x33   : > { %s1110_s7 = sshll.u32 %s208_s29, 3  ;;  %s1645_s10 = scalar_lea.hbm %s1834_s0, %s1111_s6 }
  0x34   : > { %s212_s11 = scalar_lea.vmem [#allocation2], %s1110_s7  ;;  %p1647_p11 = pnand %p1274_p9, %p38_p12 }
  0x35   : > { %s219_s12 = sshll.u32 %s212_s11, 4  ;;  %s209_s14 = scalar_lea.sflag [#allocation3], %s208_s29  ;;  %s220_s12 = int_to_ptr.vmem [resolvable:$true] %s219_s12 }
  0x36   : > { %s1400_s15 = scalar_lea.hbm %s1645_s10, 128  ;;  %p1402_p0 = pneg %p1647_p11 }
  0x37   : > { %p1401_p13 = scmp.ne.s32.totalorder %s1645_s10, %s1400_s15  ;;  %s1405_s27 = scalar_lea.hbm %s1834_s0, 256 }
  0x38   : > { %p1406_p1 = scmp.lt.s32.totalorder %s1645_s10, %s1834_s0  ;;  %p1407_p2 = scmp.lt.s32.totalorder %s1405_s27, %s1400_s15 }
  0x39   : > { %p1403_p5 = pnand %p1402_p0, %p1401_p13 }
  0x3a   : > { %p1408_p6 = por %p1407_p2, %p1406_p1 }
  0x3b   : > { %p1404_p10 = pneg %p1403_p5 }
  0x3d   : > { %p1409_p12 = pnand %p1408_p6, %p1404_p10 }
  0x3f   : > { %1412 = shalt.err (!%p1409_p12)
}
  0x40   : > { %s1413_s8 = scalar_lea.vmem %s220_s12, 128  ;;  %s1504_s29 = smov [#allocation2]  }
  0x41   : > { %p1414_p3 = scmp.ne.s32.totalorder %s220_s12, %s1413_s8  ;;  %s1418_s9 = sshll.u32 %s1504_s29, 4  ;;  %s1419_s9 = int_to_ptr.vmem [resolvable:$false] %s1418_s9 }
  0x42   : > { %s1420_s11 = scalar_lea.vmem %s1419_s9, 256  ;;  %p1421_p13 = scmp.lt.s32.totalorder %s220_s12, %s1419_s9 }
  0x43   : > { %p1416_p9 = pnand %p1414_p3, %p1402_p0  ;;  %p1422_p5 = scmp.lt.s32.totalorder %s1420_s11, %s1413_s8 }
  0x45   : > { %p1417_p7 = pneg %p1416_p9  ;;  %p1423_p4 = por %p1422_p5, %p1421_p13 }
  0x47   : > { %p1424_p8 = pnand %p1423_p4, %p1417_p7 }
  0x49   : > { %1427 = shalt.err (!%p1424_p8)
}
  0x4a   : > { %1267 = dma.hbm_to_vmem [thread:$0]  (!%p1647_p11), %s1645_s10, 128, %s220_s12, %s209_s14  }
  0x4b   : > { %p1851_p10 = scmp.ne.s32.totalorder %s1846_s26, 0 }
  0x4c   : > { %s1668_s15 = sand.u32 (!%p1851_p10), 1, %s1488_s19   ;;  %p1852_p4 = scmp.ne.s32.totalorder (!%p1851_p10), %s1844_s24, 0 }
  0x4d   : > { %228 = sbr.rel (%p1851_p10) target bundleno = 2574 (0xa0e), region = 40  ;;  %s1113_s16 = sshll.u32 (!%p1851_p10), %s1668_s15, 3 }
  0x4e   : > { %s231_s23 = scalar_lea.sflag (!%p1851_p10), [#allocation3], %s1668_s15  ;;  %s234_s27 = scalar_lea.vmem (!%p1851_p10), [#allocation2], %s1113_s16 }
  0x52   : > { %1471 = dma.done.wait (%p1852_p4), %s231_s23, 128  }
  0x53   : > { %1473 = vsyncadd (%p1852_p4), %s231_s23, 4294967168  ;;  %p1853_p8 = scmp.eq.s32.totalorder %s1571_s22, 0 }
  0x55   : > { %1475 = dma.done.wait (%p1853_p8), [#allocation6], 768   ;;  %p1854_p7 = pmov %p1853_p8 }
  0x56   : > { %v1505_v0 = vmov 0.0   ;;  %vm1506_vm0 = vmmov 0   ;;  %v1330_v1 = vld [vmem:[#allocation5 + $0x8] sm:$0xff]   ;;  %v1331_v2 = vld [vmem:[#allocation5] sm:$0xff]   ;;  %v270_v3 = vld [vmem:[%s234_s27] sm:$0xff]  ;;  %vm295_vm1 = vcmask 261120   ;;  %v339_v17 = vlaneseq }
  0x57   : > { %1477 = vsyncadd (%p1854_p7), [#allocation6], 4294966528  ;;  %1165 = vmatprep.subr.bf16.mxu0 %v1505_v0  ;;  %1169 = vmatprep.mubr.msk.bf16.mxu0 %vm1506_vm0, %v1505_v0  ;;  %v271_v4 = vpack.c.bf16 %v270_v3, %v270_v3  ;;  %v1117_v5 = vld [vmem:[%s1836_s2] ss:$0 sm:$0xff]  ;;  %s1507_s10 = smov 120   ;;  %s1508_s12 = smov 96  }
  0x58   : > { %1173 = vmatprep.subr.bf16.mxu1 %v1505_v0  ;;  %1175 = vmatprep.mubr.msk.bf16.mxu1 %vm1506_vm0, %v1505_v0  ;;  %s1509_s13 = smov 88   ;;  %vm350_vm2 = vcmask 64512   ;;  %v340_v18 = vshrl.u32 %v339_v17, 7  ;;  %v342_v19 = vand.u32 127, %v339_v17  ;;  %v1510_v21 = vmov -1e+30  }
  0x59   : > { %1166 = vmatpush3.bf16.msra.mxu0 %v1330_v1  ;;  %s1511_s14 = smov 64   ;;  %s1512_s6 = smov 56   ;;  %vm416_vm4 = vcmask 1043456   ;;  %v460_v58 = vld [vmem:[#allocation7] sm:$0xff]  ;;  %v575_v61 = vld [vmem:[#allocation7 + $0x8] sm:$0xff] }
  0x5a   : > { %1167 = vmatprep.subr.bf16.mxu0 %v1505_v0  ;;  %vm343_vm3 = vcmp.ge.s32.totalorder %v340_v18, %v342_v19  ;;  %s1513_s7 = smov 112   ;;  %s1514_s8 = smov 80   ;;  %v461_v59 = vpack.c.bf16 %v460_v58, %v460_v58  ;;  %v576_v62 = vpack.c.bf16 %v575_v61, %v575_v61 }
  0x5b   : > { %v1712_v22 = vsel %vm343_vm3, 0.0, %v1510_v21  ;;  %s1515_s29 = smov 72   ;;  %s1516_s9 = smov 104  }
  0x5c   : > { %v628_v60 = vsel %vm416_vm4, %v461_v59, 0  ;;  %v582_v63 = vsel %vm416_vm4, %v576_v62, 0  ;;  %s1517_s11 = smov 48   ;;  %s1518_s23 = smov 40  }
  0x5d   : > { %1168 = vmatpush3.bf16.msra.mxu0 %v1331_v2  ;;  %s1135_s26 = sshll.u32 %s1571_s22, 7  ;;  %s1003_s22 = scalar_lea.sflag [#allocation4], %s1668_s15 }
  0x5e   : > { %1179 = vmatprep.subr.bf16.mxu0 %v1505_v0  ;;  %p1855_p0 = scmp.ne.s32.totalorder %s1849_s30, 0 }
  0x60   : > { %1170 = vmatmul.mubr.msk.bf16.vlgmr.msra.gmra.mxu0 %vm295_vm1, %v271_v4 }
  0x61   : > { %1181 = vmatprep.mubr.msk.bf16.mxu0 %vm1506_vm0, %v1505_v0 }
 0x120   : > { %v333_v6 = vpop.f32.mrf.mxu0 }
 0x121   : > { %v334_v7 = vadd.f32 %v1117_v5, %v333_v6 }
 0x122   : > { %v1171_v8 = vpop.f32.mrf.mxu0 }
 0x123   : > { %v1696_v9 = vpack.c.bf16 %v334_v7, %v334_v7 }
 0x124   : > { %v336_v10 = vpop.f32.mrf.mxu0 }
 0x125   : > { %463 = vrot.lane.b32.xlu1 %v1696_v9, %s1507_s10  ;;  %348 = vrot.lane.b32.xlu0 %v1696_v9, %s1508_s12  ;;  %s268_s10 = scalar_lea.vmem [#allocation8], %s1113_s16 }
 0x126   : > { %v1172_v11 = vpop.f32.mrf.mxu0  ;;  %s1016_s12 = sshll.u32 %s268_s10, 4  ;;  %s1792_s12 = int_to_ptr.vmem [resolvable:$true] %s1016_s12 }
 0x127   : > { %s1428_s16 = scalar_lea.vmem %s1792_s12, 128 }
 0x128   : > { %p1429_p11 = scmp.ne.s32.totalorder %s1792_s12, %s1428_s16 }
 0x129   : > { %465 = vrot.lane.b32.xlu0 %v1696_v9, %s1509_s13 }
 0x12a   : > { %p1430_p1 = pnand %p1429_p11, %p1855_p0 }
 0x12c   : > { %p1431_p2 = pneg %p1430_p1 }
 0x197   : > { %v349_v12 = vpop.permute.xlu0 %348  ;;  %v464_v16 = vpop.permute.xlu1 %463 }
 0x198   : > { %v355_v13 = vsel %vm350_vm2, %v349_v12, 0 }
 0x199   : > { %1174 = vmatpush3.bf16.xpose.msra.mxu1 %v355_v13 }
 0x19a   : > { %1185 = vmatprep.subr.bf16.mxu1 %v1505_v0 }
 0x19b   : > { %v466_v14 = vpop.permute.xlu0 %465 }
 0x19c   : > { %v471_v15 = vsel %vm350_vm2, %v466_v14, 0 }
 0x1a0   : > { %1176 = vmatmul.mubr.msk.bf16.vlgmr.msra.gmra.mxu1 %vm350_vm2, %v1696_v9 }
 0x1a1   : > { %1186 = vmatpush3.bf16.xpose.msra.mxu1 %v471_v15  ;;  %1187 = vmatprep.mubr.msk.bf16.mxu1 %vm1506_vm0, %v1505_v0 }
 0x1a2   : > { %1197 = vmatprep.subr.bf16.mxu1 %v1505_v0 }
 0x1a8   : > { %1188 = vmatmul.mubr.msk.bf16.vlgmr.msra.gmra.mxu1 %vm350_vm2, %v464_v16 }
 0x1a9   : > { %1199 = vmatprep.mubr.msk.bf16.mxu1 %vm1506_vm0, %v1505_v0  ;;  %1198 = vmatpush3.bf16.msra.mxu1 %v582_v63 }
 0x1aa   : > { %1209 = vmatprep.subr.bf16.mxu1 %v1505_v0 }
 0x260   : > { %v391_v20 = vpop.f32.mrf.mxu1 }
 0x261   : > { %v397_v23 = vmul.f32 0.35355338, %v391_v20 }
 0x262   : > { %v1177_v24 = vpop.f32.mrf.mxu1 }
 0x263   : > { %v398_v25 = vadd.f32 %v397_v23, %v1712_v22 }
 0x264   : > { %v394_v26 = vpop.f32.mrf.mxu1 }
 0x265   : > { %v399_v27 = vsel %vm350_vm2, %v398_v25, -inf }
 0x266   : > { %400 = vmax.xlane.f32.xlu1 %v399_v27  ;;  %v1178_v28 = vpop.f32.mrf.mxu1 }
 0x268   : > { %v507_v29 = vpop.f32.mrf.mxu1 }
 0x269   : > { %v513_v30 = vmul.f32 0.35355338, %v507_v29 }
 0x26a   : > { %v1189_v31 = vpop.f32.mrf.mxu1 }
 0x26b   : > { %v514_v32 = vadd.f32 %v513_v30, %v1712_v22 }
 0x26c   : > { %v510_v33 = vpop.f32.mrf.mxu1 }
 0x26d   : > { %v515_v34 = vsel %vm350_vm2, %v514_v32, -inf }
 0x26e   : > { %516 = vmax.xlane.f32.xlu0 %v515_v34  ;;  %v1190_v35 = vpop.f32.mrf.mxu1 }
 0x2ef   : > { %v401_v36 = vpop.xlane.xlu1 %400 }
 0x2f0   : > { %v402_v37 = vsub.f32 %v398_v25, %v401_v36 }
 0x2f2   : > { %v403_v38 = vmul.f32 1.442695, %v402_v37 }
 0x2f4   : > { %1332 = vpow2.f32 %v403_v38 }
 0x2f7   : > { %v517_v39 = vpop.xlane.xlu0 %516 }
 0x2f8   : > { %v518_v40 = vsub.f32 %v514_v32, %v517_v39 }
 0x2fa   : > { %v519_v41 = vmul.f32 1.442695, %v518_v40 }
 0x2fc   : > { %1334 = vpow2.f32 %v519_v41 }
 0x301   : > { %v1333_v42 = vpop.eup %1332 }
 0x302   : > { %v405_v43 = vsel %vm350_vm2, %v1333_v42, 0.0 }
 0x303   : > { %406 = vadd.xlane.f32.xlu0 %v405_v43 }
 0x309   : > { %v1335_v44 = vpop.eup %1334 }
 0x30a   : > { %v521_v45 = vsel %vm350_vm2, %v1335_v44, 0.0 }
 0x30b   : > { %522 = vadd.xlane.f32.xlu1 %v521_v45 }
 0x319   : > { %411 = vrot.lane.b32.xlu0 %v1696_v9, %s1511_s14 }
 0x31c   : > { %527 = vrot.lane.b32.xlu1 %v1696_v9, %s1512_s6  ;;  %s1790_s6 = scalar_lea.hbm %s1839_s5, %s1135_s26 }
 0x31d   : > { %670 = vrot.lane.b32.xlu0 %v1696_v9, %s1513_s7  ;;  %s1519_s7 = smov [#allocation8]  }
 0x320   : > { %672 = vrot.lane.b32.xlu1 %v1696_v9, %s1514_s8  ;;  %s1432_s8 = sshll.u32 %s1519_s7, 4  ;;  %s1433_s8 = int_to_ptr.vmem [resolvable:$false] %s1432_s8 }
 0x321   : > { %p1435_p6 = scmp.lt.s32.totalorder %s1792_s12, %s1433_s8 }
 0x38c   : > { %v407_v46 = vpop.xlane.xlu0 %406 }
 0x38d   : > { %1336 = vrcp.f32 %v407_v46  ;;  %v782_v46 = vld [vmem:[#allocation7 + $0x10] sm:$0xff] }
 0x390   : > { %v412_v47 = vpop.permute.xlu0 %411 }
 0x391   : > { %v418_v48 = vsel %vm416_vm4, %v412_v47, 0  ;;  %v783_v47 = vpack.c.bf16 %v782_v46, %v782_v46 }
 0x392   : > { %1180 = vmatpush3.bf16.msra.mxu0 %v418_v48 }
 0x393   : > { %1191 = vmatprep.subr.bf16.mxu0 %v1505_v0  ;;  %v789_v48 = vsel %vm416_vm4, %v783_v47, 0 }
 0x394   : > { %v523_v49 = vpop.xlane.xlu1 %522  ;;  %v671_v14 = vpop.permute.xlu0 %670 }
 0x395   : > { %1338 = vrcp.f32 %v523_v49 }
 0x398   : > { %v528_v52 = vpop.permute.xlu1 %527 }
 0x399   : > { %v533_v54 = vsel %vm416_vm4, %v528_v52, 0 }
 0x39a   : > { %v1337_v50 = vpop.eup %1336 }
 0x39b   : > { %v409_v51 = vmul.f32 %v1337_v50, %v1333_v42 }
 0x39c   : > { %v673_v6 = vpop.permute.xlu1 %672 }
 0x39d   : > { %v410_v53 = vpack.c.bf16 %v409_v51, %v409_v51  ;;  %v678_v11 = vsel %vm350_vm2, %v673_v6, 0 }
 0x39f   : > { %1182 = vmatmul.mubr.msk.bf16.vlgmr.msra.gmra.mxu0 %vm350_vm2, %v410_v53 }
 0x3a0   : > { %1192 = vmatpush3.bf16.msra.mxu0 %v533_v54  ;;  %1193 = vmatprep.mubr.msk.bf16.mxu0 %vm1506_vm0, %v1505_v0 }
 0x3a1   : > { %1203 = vmatprep.subr.bf16.mxu0 %v1505_v0 }
 0x3a2   : > { %v1339_v55 = vpop.eup %1338 }
 0x3a3   : > { %v525_v56 = vmul.f32 %v1339_v55, %v1335_v44 }
 0x3a5   : > { %v526_v57 = vpack.c.bf16 %v525_v56, %v525_v56 }
 0x3a7   : > { %1194 = vmatmul.mubr.msk.bf16.vlgmr.msra.gmra.mxu0 %vm350_vm2, %v526_v57 }
 0x3a8   : > { %1205 = vmatprep.mubr.msk.bf16.mxu0 %vm1506_vm0, %v1505_v0  ;;  %1204 = vmatpush3.bf16.msra.mxu0 %v628_v60 }
 0x3a9   : > { %1215 = vmatprep.subr.bf16.mxu0 %v1505_v0 }
 0x45f   : > { %v454_v1 = vpop.f32.mrf.mxu0 }
 0x460   : > { %v462_v2 = vpack.c.bf16 %v454_v1, %v454_v1 }
 0x461   : > { %v1183_v3 = vpop.f32.mrf.mxu0 }
 0x462   : > { %1206 = vmatmul.mubr.msk.bf16.vlgmr.msra.gmra.mxu0 %vm350_vm2, %v462_v2 }
 0x463   : > { %v457_v4 = vpop.f32.mrf.mxu0  ;;  %1217 = vmatprep.mubr.msk.bf16.mxu0 %vm1506_vm0, %v1505_v0 }
 0x465   : > { %v1184_v5 = vpop.f32.mrf.mxu0 }
 0x467   : > { %v569_v7 = vpop.f32.mrf.mxu0 }
 0x468   : > { %v577_v8 = vpack.c.bf16 %v569_v7, %v569_v7  ;;  %v944_v7 = vld [vmem:[#allocation7 + $0x18] sm:$0xff] }
 0x469   : > { %v1195_v10 = vpop.f32.mrf.mxu0 }
 0x46a   : > { %1200 = vmatmul.mubr.msk.bf16.vlgmr.msra.gmra.mxu1 %vm350_vm2, %v577_v8  ;;  %v945_v8 = vpack.c.bf16 %v944_v7, %v944_v7 }
 0x46b   : > { %1210 = vmatpush3.bf16.xpose.msra.mxu1 %v678_v11  ;;  %v572_v12 = vpop.f32.mrf.mxu0  ;;  %1211 = vmatprep.mubr.msk.bf16.mxu1 %vm1506_vm0, %v1505_v0 }
 0x46c   : > { %1221 = vmatprep.subr.bf16.mxu1 %v1505_v0  ;;  %v951_v10 = vsel %vm416_vm4, %v945_v8, 0 }
 0x46d   : > { %v1196_v13 = vpop.f32.mrf.mxu0 }
 0x472   : > { %1212 = vmatmul.mubr.msk.bf16.vlgmr.msra.gmra.mxu1 %vm350_vm2, %v671_v14 }
 0x473   : > { %1223 = vmatprep.mubr.msk.bf16.mxu1 %vm1506_vm0, %v1505_v0  ;;  %1222 = vmatpush3.bf16.msra.mxu1 %v789_v48 }
 0x474   : > { %1233 = vmatprep.subr.bf16.mxu1 %v1505_v0 }
 0x522   : > { %v664_v15 = vpop.f32.mrf.mxu0 }
 0x524   : > { %v1207_v16 = vpop.f32.mrf.mxu0 }
 0x526   : > { %v667_v17 = vpop.f32.mrf.mxu0 }
 0x528   : > { %v1208_v18 = vpop.f32.mrf.mxu0 }
 0x52a   : > { %v618_v19 = vpop.f32.mrf.mxu1 }
 0x52b   : > { %v1749_v20 = vadd.f32 %v664_v15, %v618_v19 }
 0x52c   : > { %v1201_v21 = vpop.f32.mrf.mxu1 }
 0x52e   : > { %v621_v23 = vpop.f32.mrf.mxu1 }
 0x530   : > { %v1202_v24 = vpop.f32.mrf.mxu1 }
 0x532   : > { %v714_v25 = vpop.f32.mrf.mxu1 }
 0x533   : > { %v720_v26 = vmul.f32 0.35355338, %v714_v25 }
 0x534   : > { %v1213_v27 = vpop.f32.mrf.mxu1 }
 0x535   : > { %v721_v28 = vadd.f32 %v720_v26, %v1712_v22 }
 0x536   : > { %v717_v29 = vpop.f32.mrf.mxu1 }
 0x537   : > { %v722_v30 = vsel %vm350_vm2, %v721_v28, -inf }
 0x538   : > { %723 = vmax.xlane.f32.xlu1 %v722_v30  ;;  %v1214_v31 = vpop.f32.mrf.mxu1 }
 0x549   : > { %834 = vrot.lane.b32.xlu1 %v1696_v9, %s1515_s29  ;;  %s1434_s29 = scalar_lea.vmem %s1433_s8, 256 }
 0x54a   : > { %p1436_p12 = scmp.lt.s32.totalorder %s1434_s29, %s1428_s16 }
 0x54c   : > { %p1437_p3 = por %p1436_p12, %p1435_p6 }
 0x54d   : > { %832 = vrot.lane.b32.xlu1 %v1696_v9, %s1516_s9 }
 0x54e   : > { %p1438_p9 = pnand %p1437_p3, %p1431_p2 }
 0x5c1   : > { %v724_v32 = vpop.xlane.xlu1 %723 }
 0x5c2   : > { %v725_v33 = vsub.f32 %v721_v28, %v724_v32 }
 0x5c4   : > { %v726_v34 = vmul.f32 1.442695, %v725_v33 }
 0x5c5   : > { %v835_v42 = vpop.permute.xlu1 %834 }
 0x5c6   : > { %1340 = vpow2.f32 %v726_v34  ;;  %v840_v44 = vsel %vm350_vm2, %v835_v42, 0 }
 0x5c9   : > { %v833_v45 = vpop.permute.xlu1 %832 }
 0x5d3   : > { %v1341_v35 = vpop.eup %1340 }
 0x5d4   : > { %v728_v36 = vsel %vm350_vm2, %v1341_v35, 0.0 }
 0x5d5   : > { %729 = vadd.xlane.f32.xlu0 %v728_v36 }
 0x5eb   : > { %734 = vrot.lane.b32.xlu0 %v1696_v9, %s1517_s11 }
 0x65e   : > { %v730_v37 = vpop.xlane.xlu0 %729 }
 0x65f   : > { %1342 = vrcp.f32 %v730_v37 }
 0x662   : > { %v735_v38 = vpop.permute.xlu0 %734 }
 0x663   : > { %v740_v39 = vsel %vm416_vm4, %v735_v38, 0 }
 0x664   : > { %1216 = vmatpush3.bf16.msra.mxu0 %v740_v39 }
 0x665   : > { %1227 = vmatprep.subr.bf16.mxu0 %v1505_v0 }
 0x66c   : > { %v1343_v40 = vpop.eup %1342 }
 0x66d   : > { %v732_v41 = vmul.f32 %v1343_v40, %v1341_v35 }
 0x66f   : > { %v733_v43 = vpack.c.bf16 %v732_v41, %v732_v41 }
 0x671   : > { %1218 = vmatmul.mubr.msk.bf16.vlgmr.msra.gmra.mxu0 %vm350_vm2, %v733_v43 }
 0x672   : > { %1228 = vmatpush3.bf16.xpose.msra.mxu0 %v840_v44  ;;  %1229 = vmatprep.mubr.msk.bf16.mxu0 %vm1506_vm0, %v1505_v0 }
 0x673   : > { %1239 = vmatprep.subr.bf16.mxu0 %v1505_v0 }
 0x679   : > { %1230 = vmatmul.mubr.msk.bf16.vlgmr.msra.gmra.mxu0 %vm350_vm2, %v833_v45 }
 0x67a   : > { %1241 = vmatprep.mubr.msk.bf16.mxu0 %vm1506_vm0, %v1505_v0  ;;  %1240 = vmatpush3.bf16.msra.mxu0 %v951_v10 }
 0x731   : > { %v776_v49 = vpop.f32.mrf.mxu0 }
 0x732   : > { %v784_v50 = vpack.c.bf16 %v776_v49, %v776_v49 }
 0x733   : > { %v1219_v51 = vpop.f32.mrf.mxu0 }
 0x734   : > { %1224 = vmatmul.mubr.msk.bf16.vlgmr.msra.gmra.mxu1 %vm350_vm2, %v784_v50 }
 0x735   : > { %v779_v52 = vpop.f32.mrf.mxu0  ;;  %1235 = vmatprep.mubr.msk.bf16.mxu1 %vm1506_vm0, %v1505_v0 }
 0x737   : > { %v1220_v53 = vpop.f32.mrf.mxu0 }
 0x739   : > { %v876_v54 = vpop.f32.mrf.mxu0 }
 0x73a   : > { %v882_v55 = vmul.f32 0.35355338, %v876_v54 }
 0x73b   : > { %v1231_v56 = vpop.f32.mrf.mxu0 }
 0x73c   : > { %v883_v57 = vadd.f32 %v882_v55, %v1712_v22 }
 0x73d   : > { %v879_v58 = vpop.f32.mrf.mxu0 }
 0x73e   : > { %v884_v59 = vsel %vm350_vm2, %v883_v57, -inf }
 0x73f   : > { %885 = vmax.xlane.f32.xlu0 %v884_v59  ;;  %v1232_v60 = vpop.f32.mrf.mxu0 }
 0x755   : > { %896 = vrot.lane.b32.xlu0 %v1696_v9, %s1518_s23 }
 0x7c8   : > { %v886_v61 = vpop.xlane.xlu0 %885 }
 0x7c9   : > { %v887_v62 = vsub.f32 %v883_v57, %v886_v61 }
 0x7cb   : > { %v888_v63 = vmul.f32 1.442695, %v887_v62 }
 0x7cc   : > { %v897_v1 = vpop.permute.xlu0 %896 }
 0x7cd   : > { %1344 = vpow2.f32 %v888_v63  ;;  %v902_v0 = vsel %vm416_vm4, %v897_v1, 0 }
 0x7ce   : > { %1234 = vmatpush3.bf16.msra.mxu1 %v902_v0 }
 0x7da   : > { %v1345_v2 = vpop.eup %1344 }
 0x7db   : > { %v890_v3 = vsel %vm350_vm2, %v1345_v2, 0.0 }
 0x7dc   : > { %891 = vadd.xlane.f32.xlu1 %v890_v3 }
 0x7f4   : > { %v825_v22 = vpop.f32.mrf.mxu1 }
 0x7f5   : > { %v831_v4 = vadd.f32 %v825_v22, %v1749_v20  ;;  %v1133_v20 = vld [vmem:[%s1838_s4] ss:$0 sm:$0xff] }
 0x7f6   : > { %v1225_v5 = vpop.f32.mrf.mxu1 }
 0x7f8   : > { %v828_v6 = vpop.f32.mrf.mxu1 }
 0x7fa   : > { %v1226_v9 = vpop.f32.mrf.mxu1 }
 0x865   : > { %v892_v11 = vpop.xlane.xlu1 %891 }
 0x866   : > { %1346 = vrcp.f32 %v892_v11 }
 0x873   : > { %v1347_v12 = vpop.eup %1346 }
 0x874   : > { %v894_v13 = vmul.f32 %v1347_v12, %v1345_v2 }
 0x876   : > { %v895_v14 = vpack.c.bf16 %v894_v13, %v894_v13 }
 0x878   : > { %1236 = vmatmul.mubr.msk.bf16.vlgmr.msra.gmra.mxu1 %vm350_vm2, %v895_v14 }
 0x938   : > { %v938_v15 = vpop.f32.mrf.mxu1 }
 0x939   : > { %v946_v16 = vpack.c.bf16 %v938_v15, %v938_v15 }
 0x93a   : > { %v1237_v17 = vpop.f32.mrf.mxu1 }
 0x93b   : > { %1242 = vmatmul.mubr.msk.bf16.vlgmr.msra.gmra.mxu0 %vm350_vm2, %v946_v16 }
 0x93c   : > { %v941_v18 = vpop.f32.mrf.mxu1 }
 0x93e   : > { %v1238_v19 = vpop.f32.mrf.mxu1 }
 0x9fb   : > { %v987_v21 = vpop.f32.mrf.mxu0 }
 0x9fc   : > { %v993_v23 = vadd.f32 %v987_v21, %v831_v4 }
 0x9fd   : > { %v1243_v24 = vpop.f32.mrf.mxu0 }
 0x9fe   : > { %v1000_v25 = vadd.f32 %v1133_v20, %v993_v23 }
 0x9ff   : > { %v990_v26 = vpop.f32.mrf.mxu0 }
 0xa00   : > { %1001 = vst.msk [vmem:[%s268_s10] sm:$0xff] %vm295_vm1, %v1000_v25 }
 0xa01   : > { %v1244_v27 = vpop.f32.mrf.mxu0 }
 0xa02   : > { %1441 = shalt.err (!%p1438_p9)
}
 0xa03   : > { %s1442_s9 = scalar_lea.hbm %s1790_s6, 128  ;;  %s1446_s23 = scalar_lea.hbm %s1839_s5, 256 }
 0xa04   : > { %p1443_p13 = scmp.ne.s32.totalorder %s1790_s6, %s1442_s9  ;;  %p1447_p4 = scmp.lt.s32.totalorder %s1790_s6, %s1839_s5 }
 0xa05   : > { %p1448_p8 = scmp.lt.s32.totalorder %s1446_s23, %s1442_s9 }
 0xa06   : > { %p1444_p5 = pnand %p1443_p13, %p1855_p0 }
 0xa07   : > { %p1449_p7 = por %p1448_p8, %p1447_p4 }
 0xa08   : > { %p1445_p10 = pneg %p1444_p5 }
 0xa0a   : > { %p1450_p11 = pnand %p1449_p7, %p1445_p10 }
 0xa0c   : > { %1453 = shalt.err (!%p1450_p11)
}
 0xa0d   : > { %1255 = dma.vmem_to_hbm [thread:$0]  (%p1855_p0), %s1792_s12, 128, %s1790_s6, %s1003_s22  }
 0xa0e PF: > { %s1028_s26 = sand.u32 1, %s1484_s18   ;;  %p1856_p1 = scmp.ne.s32.totalorder %s1845_s25, 0 }
 0xa0f   : > { %p1857_p2 = scmp.ge.s32.totalorder %s1496_s21, 2  ;;  %s1029_s10 = scalar_lea.sflag [#allocation4], %s1028_s26 }
 0xa11   : > { %p1269_p6 = pnand %p1857_p2, %p1856_p1 }
 0xa13   : > { %p1270_p12 = pneg %p1269_p6 }
 0xa15   : > { %1479 = dma.done.wait (%p1270_p12), %s1029_s10, 128  }
 0xa16   : > { %1481 = vsyncadd (%p1270_p12), %s1029_s10, 4294967168  ;;  %p19_p3 = scmp.ge.s32.totalorder %s1622_s17, 4   ;;  %s1858_s18 = smov %s1488_s19 }
 0xa17   : > { %s1859_s19 = smov %s1492_s20  ;;  %s1860_s20 = smov %s1631_s28 }
 0xa18   : > { %s1861_s21 = smov %s1622_s17  ;;  %21 = sbr.rel (!%p19_p3) target bundleno = 6 (0x6), region = 93 }
 0xa1d   :  { %1034 = vsyncpa [#allocation3], 1 }
 0xa1e   :  { %1036 = vsyncpa [#allocation3 + $0x1], 1 }
 0xa1f   :  { %1037 = vsyncpa [#allocation6], 1 }
 0xa20   :  { %1038 = vsyncpa [#allocation4], 1 }
 0xa21   :  { %1040 = vsyncpa [#allocation4 + $0x1], 1 }

</bundles_post_ra>
